<compile_context>
chip_gen: v5e
topology: v5e:2x2
jax: 0.10.0
libtpu: 0.0.40
codegen_flags: <defaults>
</compile_context>

<pallas_src>
import math

import jax
import jax.numpy as jnp
import numpy as np
from jax.experimental import pallas as pl
from jax.experimental.pallas import tpu as pltpu

BN_EPS = 1e-3  # BatchNorm1d(..., eps=0.001)


# ---------------------------------------------------------------------------
# Pallas kernel
# ---------------------------------------------------------------------------
def _make_kernel(batch, n_hidden, n_latent, out_lanes):
    inv_n = 1.0 / float(batch)
    pad = out_lanes - 3 * n_latent

    def kernel(x_ref, eps_ref, w1_ref, slab_ref, wh_ref, out_ref):
        x = x_ref[...]
        eps = eps_ref[...]
        slab = slab_ref[...]

        b1 = slab[0:1, :n_hidden]
        gamma = slab[1:2, :n_hidden]
        beta = slab[2:3, :n_hidden]
        b_heads = slab[3:4, : 2 * n_latent]  # [b_mu | b_var]

        # FCLayers "Layer 0": Linear -> BatchNorm1d (training stats) -> ReLU.
        h = jnp.dot(x, w1_ref[...], preferred_element_type=jnp.float32) + b1
        # One-pass BN statistics: two independent sublane reductions.
        mean = jnp.sum(h, axis=0, keepdims=True) * inv_n
        mean_sq = jnp.sum(h * h, axis=0, keepdims=True) * inv_n
        var = mean_sq - mean * mean
        q = jnp.maximum(
            gamma * (h - mean) * jax.lax.rsqrt(var + BN_EPS) + beta, 0.0
        )
        # TODO(synk): Dropout(p=0.1) applied as identity (eval semantics).

        # Fused mean/var heads: one MXU matmul, slice along lanes.
        heads = jnp.dot(q, wh_ref[...], preferred_element_type=jnp.float32) + b_heads
        q_m = heads[:, :n_latent]
        q_v = 1e-16 + jnp.exp(heads[:, n_latent:])
        latent = q_m + eps * jnp.sqrt(q_v)  # Normal(q_m, sqrt(q_v)).rsample()

        packed = jnp.concatenate([q_m, q_v, latent], axis=-1)
        if pad:
            packed = jnp.concatenate(
                [packed, jnp.zeros((batch, pad), jnp.float32)], axis=-1
            )
        out_ref[...] = packed  # single lane-dense store

    return kernel


# ---------------------------------------------------------------------------
# Host-side parameter packing (few lane-dense slabs, fused head weights)
# ---------------------------------------------------------------------------
def pack_encoder_params(w1, b1, bn_gamma, bn_beta, w_mu, b_mu, w_var, b_var):
    n_hidden = w1.shape[1]
    n_latent = w_mu.shape[1]
    wmax = max(n_hidden, 2 * n_latent)

    def row(v):
        v = v.reshape(1, -1).astype(jnp.float32)
        return jnp.pad(v, ((0, 0), (0, wmax - v.shape[1])))

    slab = jnp.concatenate(
        [row(b1), row(bn_gamma), row(bn_beta),
         row(jnp.concatenate([b_mu, b_var], axis=-1))],
        axis=0,
    )  # (4, wmax): [b1; gamma; beta; b_mu|b_var]
    w_heads = jnp.concatenate([w_mu, w_var], axis=1)  # (n_hidden, 2*n_latent)
    return w1.astype(jnp.float32), slab, w_heads.astype(jnp.float32)


# ---------------------------------------------------------------------------
# Wrapper
# ---------------------------------------------------------------------------
def encoder_forward(x, eps, packed_params):
    w1, slab, w_heads = packed_params
    batch = x.shape[0]
    n_hidden = w1.shape[1]
    n_latent = w_heads.shape[1] // 2
    out_lanes = max(128, ((3 * n_latent + 127) // 128) * 128)

    kernel = _make_kernel(batch, n_hidden, n_latent, out_lanes)
    vmem = pl.BlockSpec(memory_space=pltpu.MemorySpace.VMEM)
    out = pl.pallas_call(
        kernel,
        out_shape=jax.ShapeDtypeStruct((batch, out_lanes), jnp.float32),
        in_specs=[vmem] * 5,
        out_specs=vmem,
    )(x, eps, w1, slab, w_heads)

    q_m = out[:, :n_latent]
    q_v = out[:, n_latent : 2 * n_latent]
    latent = out[:, 2 * n_latent : 3 * n_latent]
    return dict(q_m=q_m, q_v=q_v, latent=latent)


# ---------------------------------------------------------------------------
# Deterministic parameter init (mimics the PyTorch defaults)
# ---------------------------------------------------------------------------
def init_encoder_params(key, n_input, n_hidden, n_latent):
    k1, k2, k3 = jax.random.split(key, 3)

    def linear(k, fan_in, fan_out):
        kw, kb = jax.random.split(k)
        bound = 1.0 / math.sqrt(fan_in)
        w = jax.random.uniform(kw, (fan_in, fan_out), jnp.float32, -bound, bound)
        b = jax.random.uniform(kb, (fan_out,), jnp.float32, -bound, bound)
        return w, b

    w1, b1 = linear(k1, n_input, n_hidden)
    gamma = jnp.ones((n_hidden,), jnp.float32)
    beta = jnp.zeros((n_hidden,), jnp.float32)
    w_mu, b_mu = linear(k2, n_hidden, n_latent)
    w_var, b_var = linear(k3, n_hidden, n_latent)
    return w1, b1, gamma, beta, w_mu, b_mu, w_var, b_var


# Pure-JAX reference of the same forward (for correctness check).
def encoder_reference(x, eps, raw_params):
    w1, b1, gamma, beta, w_mu, b_mu, w_var, b_var = raw_params
    h = x @ w1 + b1
    mean = jnp.mean(h, axis=0, keepdims=True)
    var = jnp.mean((h - mean) ** 2, axis=0, keepdims=True)
    q = jnp.maximum(gamma * (h - mean) / jnp.sqrt(var + BN_EPS) + beta, 0.0)
    q_m = q @ w_mu + b_mu
    q_v = 1e-16 + jnp.exp(q @ w_var + b_var)
    latent = q_m + eps * jnp.sqrt(q_v)
    return dict(q_m=q_m, q_v=q_v, latent=latent)


# ---------------------------------------------------------------------------
# Demo
# ---------------------------------------------------------------------------
if __name__ == "__main__":
    batch, n_input, n_hidden, n_latent = 8, 32, 32, 16

    key = jax.random.PRNGKey(0)
    k_x, k_eps, k_p = jax.random.split(key, 3)

    x = jax.random.normal(k_x, (batch, n_input), dtype=jnp.float32)
    # Standard-normal noise for the reparameterized sample (Normal(0,1).rsample shape).
    eps = jax.random.normal(k_eps, (batch, n_latent), dtype=jnp.float32)

    raw_params = init_encoder_params(k_p, n_input, n_hidden, n_latent)
    packed_params = pack_encoder_params(*raw_params)

    out = encoder_forward(x, eps, packed_params)
    jax.block_until_ready(out["latent"])
    jax.block_until_ready(out["q_m"])
    jax.block_until_ready(out["q_v"])

    assert out["q_m"].shape == (batch, n_latent)
    assert out["q_v"].shape == (batch, n_latent)
    assert out["latent"].shape == (batch, n_latent)
    assert bool(jnp.all(out["q_v"] > 0.0))
    for v in out.values():
        assert bool(jnp.all(jnp.isfinite(v)))

    ref = encoder_reference(x, eps, raw_params)
    for name in ("q_m", "q_v", "latent"):
        np.testing.assert_allclose(
            np.asarray(out[name]), np.asarray(ref[name]), rtol=1e-2, atol=1e-2
        )

    print("KERNEL_OK")
</pallas_src>

<mosaic_0001>
module attributes {stable_mosaic.version = 11 : i64} {
  func.func @kernel(%arg0: memref<8x32xf32, #tpu.memory_space<vmem>>, %arg1: memref<8x16xf32, #tpu.memory_space<vmem>>, %arg2: memref<32x32xf32, #tpu.memory_space<vmem>>, %arg3: memref<4x32xf32, #tpu.memory_space<vmem>>, %arg4: memref<32x32xf32, #tpu.memory_space<vmem>>, %arg5: memref<8x128xf32, #tpu.memory_space<vmem>>) attributes {dimension_semantics = [], scalar_prefetch = 0 : i64, scratch_operands = 0 : i64, tpu.core_type = #tpu.core_type<tc>} {
    %c0 = arith.constant 0 : index
    %c0_0 = arith.constant 0 : index
    %0 = vector.load %arg0[%c0, %c0_0] : memref<8x32xf32, #tpu.memory_space<vmem>>, vector<8x32xf32>
    %c0_1 = arith.constant 0 : index
    %c0_2 = arith.constant 0 : index
    %1 = vector.load %arg1[%c0_1, %c0_2] : memref<8x16xf32, #tpu.memory_space<vmem>>, vector<8x16xf32>
    %c0_3 = arith.constant 0 : index
    %c0_4 = arith.constant 0 : index
    %2 = vector.load %arg3[%c0_3, %c0_4] : memref<4x32xf32, #tpu.memory_space<vmem>>, vector<4x32xf32>
    %3 = vector.extract_strided_slice %2 {offsets = [0, 0], sizes = [1, 32], strides = [1, 1]} : vector<4x32xf32> to vector<1x32xf32>
    %4 = vector.extract_strided_slice %2 {offsets = [1, 0], sizes = [1, 32], strides = [1, 1]} : vector<4x32xf32> to vector<1x32xf32>
    %5 = vector.extract_strided_slice %2 {offsets = [2, 0], sizes = [1, 32], strides = [1, 1]} : vector<4x32xf32> to vector<1x32xf32>
    %6 = vector.extract_strided_slice %2 {offsets = [3, 0], sizes = [1, 32], strides = [1, 1]} : vector<4x32xf32> to vector<1x32xf32>
    %c0_5 = arith.constant 0 : index
    %c0_6 = arith.constant 0 : index
    %7 = vector.load %arg2[%c0_5, %c0_6] : memref<32x32xf32, #tpu.memory_space<vmem>>, vector<32x32xf32>
    %cst = arith.constant dense<0.000000e+00> : vector<8x32xf32>
    %8 = tpu.matmul %0, %7, %cst {dimension_numbers = #tpu.dot_dimension_numbers<[1], [0], [0], [1], [0, 0, 1, 1], [], []>} : vector<8x32xf32>, vector<32x32xf32>, vector<8x32xf32> -> vector<8x32xf32>
    %9 = vector.broadcast %3 : vector<1x32xf32> to vector<8x32xf32>
    %10 = arith.addf %8, %9 : vector<8x32xf32>
    %cst_7 = arith.constant dense<0.000000e+00> : vector<32xf32>
    %11 = vector.multi_reduction <add>, %10, %cst_7 [0] : vector<8x32xf32> to vector<32xf32>
    %12 = vector.shape_cast %11 : vector<32xf32> to vector<1x32xf32>
    %cst_8 = arith.constant 1.250000e-01 : f32
    %13 = vector.broadcast %cst_8 : f32 to vector<1x32xf32>
    %14 = arith.mulf %12, %13 : vector<1x32xf32>
    %15 = arith.mulf %10, %10 : vector<8x32xf32>
    %cst_9 = arith.constant dense<0.000000e+00> : vector<32xf32>
    %16 = vector.multi_reduction <add>, %15, %cst_9 [0] : vector<8x32xf32> to vector<32xf32>
    %17 = vector.shape_cast %16 : vector<32xf32> to vector<1x32xf32>
    %cst_10 = arith.constant 1.250000e-01 : f32
    %18 = vector.broadcast %cst_10 : f32 to vector<1x32xf32>
    %19 = arith.mulf %17, %18 : vector<1x32xf32>
    %20 = arith.mulf %14, %14 : vector<1x32xf32>
    %21 = arith.subf %19, %20 : vector<1x32xf32>
    %22 = vector.broadcast %14 : vector<1x32xf32> to vector<8x32xf32>
    %23 = arith.subf %10, %22 : vector<8x32xf32>
    %24 = vector.broadcast %4 : vector<1x32xf32> to vector<8x32xf32>
    %25 = arith.mulf %24, %23 : vector<8x32xf32>
    %cst_11 = arith.constant 1.000000e-03 : f32
    %26 = vector.broadcast %cst_11 : f32 to vector<1x32xf32>
    %27 = arith.addf %21, %26 : vector<1x32xf32>
    %28 = math.rsqrt %27 : vector<1x32xf32>
    %29 = vector.broadcast %28 : vector<1x32xf32> to vector<8x32xf32>
    %30 = arith.mulf %25, %29 : vector<8x32xf32>
    %31 = vector.broadcast %5 : vector<1x32xf32> to vector<8x32xf32>
    %32 = arith.addf %30, %31 : vector<8x32xf32>
    %cst_12 = arith.constant 0.000000e+00 : f32
    %33 = vector.broadcast %cst_12 : f32 to vector<8x32xf32>
    %34 = arith.maximumf %32, %33 : vector<8x32xf32>
    %c0_13 = arith.constant 0 : index
    %c0_14 = arith.constant 0 : index
    %35 = vector.load %arg4[%c0_13, %c0_14] : memref<32x32xf32, #tpu.memory_space<vmem>>, vector<32x32xf32>
    %cst_15 = arith.constant dense<0.000000e+00> : vector<8x32xf32>
    %36 = tpu.matmul %34, %35, %cst_15 {dimension_numbers = #tpu.dot_dimension_numbers<[1], [0], [0], [1], [0, 0, 1, 1], [], []>} : vector<8x32xf32>, vector<32x32xf32>, vector<8x32xf32> -> vector<8x32xf32>
    %37 = vector.broadcast %6 : vector<1x32xf32> to vector<8x32xf32>
    %38 = arith.addf %36, %37 : vector<8x32xf32>
    %39 = vector.extract_strided_slice %38 {offsets = [0, 0], sizes = [8, 16], strides = [1, 1]} : vector<8x32xf32> to vector<8x16xf32>
    %40 = vector.extract_strided_slice %38 {offsets = [0, 16], sizes = [8, 16], strides = [1, 1]} : vector<8x32xf32> to vector<8x16xf32>
    %41 = math.exp %40 : vector<8x16xf32>
    %cst_16 = arith.constant 1.000000e-16 : f32
    %42 = vector.broadcast %cst_16 : f32 to vector<8x16xf32>
    %43 = arith.addf %42, %41 : vector<8x16xf32>
    %44 = math.sqrt %43 : vector<8x16xf32>
    %45 = arith.mulf %1, %44 : vector<8x16xf32>
    %46 = arith.addf %39, %45 : vector<8x16xf32>
    %47 = tpu.concatenate %39, %43, %46 in 1 : vector<8x16xf32>, vector<8x16xf32>, vector<8x16xf32> -> vector<8x48xf32>
    %cst_17 = arith.constant 0.000000e+00 : f32
    %48 = vector.broadcast %cst_17 : f32 to vector<8x80xf32>
    %49 = tpu.concatenate %47, %48 in 1 : vector<8x48xf32>, vector<8x80xf32> -> vector<8x128xf32>
    %c0_18 = arith.constant 0 : index
    %c0_19 = arith.constant 0 : index
    %50 = vector.load %arg5[%c0_18, %c0_19] : memref<8x128xf32, #tpu.memory_space<vmem>>, vector<8x128xf32>
    tpu.vector_store %arg5[%c0_18, %c0_19], %49 {strides = array<i32>} : memref<8x128xf32, #tpu.memory_space<vmem>>, vector<8x128xf32>,
    return
  }
}

</mosaic_0001>

<bundles_post_ra>
// kernel: tpu_custom_call.1
= control target key start
LH: loop header
LB: loop body
LE: loop exit
PB: predicated region body
PF: predicated region fallthrough
CT: control target
= control target key end

     0   :  { %10 = vsyncpa [#allocation3], 0  ;;  %s473_s0 = inlined_call_operand.hbm [shape: f32[8,32], index: 0, kind: input, shape index: {}]   ;;  %s474_s1 = inlined_call_operand.hbm [shape: f32[8,16], index: 1, kind: input, shape index: {}]   ;;  %s475_s2 = inlined_call_operand.hbm [shape: f32[32,32], index: 2, kind: input, shape index: {}]   ;;  %s476_s3 = inlined_call_operand.hbm [shape: f32[4,32], index: 3, kind: input, shape index: {}]   ;;  %s477_s4 = inlined_call_operand.hbm [shape: f32[32,32], index: 4, kind: input, shape index: {}]   ;;  %s478_s5 = inlined_call_operand.hbm [shape: f32[8,128], index: 5, kind: output, shape index: {}]  }
   0x1   :  { %11 = vsyncpa [#allocation6], 0 }
   0x2   :  { %12 = vsyncpa [#allocation9], 0  ;;  %s30_s20 = sshll.u32 %s474_s1, 4  ;;  %s31_s20 = int_to_ptr.hbm [resolvable:$true] %s30_s20 }
   0x3   :  { %13 = vsyncpa [#allocation4], 0  ;;  %s410_s21 = smov [#allocation5]   ;;  %s54_s25 = sshll.u32 %s476_s3, 4  ;;  %s55_s25 = int_to_ptr.hbm [resolvable:$true] %s54_s25 }
   0x4   :  { %s32_s22 = sshll.u32 %s410_s21, 4  ;;  %s411_s26 = smov [#allocation8]   ;;  %s33_s22 = int_to_ptr.vmem [resolvable:$true] %s32_s22 }
   0x5   :  { %35 = dma.hbm_to_vmem [thread:$0]  %s31_s20, 128, %s33_s22, [#allocation6]  }
   0x6   :  { %s56_s27 = sshll.u32 %s411_s26, 4  ;;  %s19_s30 = sshll.u32 %s473_s0, 4  ;;  %s57_s27 = int_to_ptr.vmem [resolvable:$true] %s56_s27  ;;  %s20_s30 = int_to_ptr.hbm [resolvable:$true] %s19_s30 }
   0x7   :  { %59 = dma.hbm_to_vmem [thread:$0]  %s55_s25, 64, %s57_s27, [#allocation9]  }
   0x8   :  { %s40_s7 = sshll.u32 %s475_s2, 4  ;;  %s412_s8 = smov [#allocation2]   ;;  %s41_s7 = int_to_ptr.hbm [resolvable:$true] %s40_s7 }
   0x9   :  { %s21_s9 = sshll.u32 %s412_s8, 4  ;;  %s413_s3 = smov [#allocation7]   ;;  %s22_s9 = int_to_ptr.vmem [resolvable:$true] %s21_s9 }
   0xa   :  { %24 = dma.hbm_to_vmem [thread:$0]  %s20_s30, 128, %s22_s9, [#allocation3]  }
   0xb   :  { %s42_s10 = sshll.u32 %s413_s3, 4  ;;  %s414_s11 = smov 128   ;;  %s43_s10 = int_to_ptr.vmem [resolvable:$true] %s42_s10 }
   0xc   :  { %s415_s12 = smov 8   ;;  %s64_s14 = sshll.u32 %s477_s4, 4  ;;  %s65_s14 = int_to_ptr.hbm [resolvable:$true] %s64_s14 }
   0xd   :  { %48 = dma.hbm_to_vmem [thread:$0]  %s41_s7, 512, %s43_s10, [#allocation6], %s414_s11, %s414_s11, %s415_s12  }
   0xe   :  { %s416_s15 = smov [#allocation10]  }
   0xf   :  { %s66_s16 = sshll.u32 %s416_s15, 4  ;;  %s67_s16 = int_to_ptr.vmem [resolvable:$true] %s66_s16 }
  0x10   :  { %72 = dma.hbm_to_vmem [thread:$0]  %s65_s14, 512, %s67_s16, [#allocation9], %s414_s11, %s414_s11, %s415_s12  }
  0x11   :  { %402 = dma.done.wait [#allocation3], 128  }
  0x12   :  { %403 = vsyncadd [#allocation3], 4294967168 }
  0x13   :  { %404 = dma.done.wait [#allocation6], 640  }
  0x14   :  { %405 = vsyncadd [#allocation6], 4294966656 }
  0x15   :  { %406 = dma.done.wait [#allocation9], 576  }
  0x16   :  { %407 = vsyncadd [#allocation9], 4294966720  ;;  %v99_v0 = vld [vmem:[#allocation7 + $0x18] sm:$0xff]  ;;  %v98_v1 = vld [vmem:[#allocation7 + $0x10] sm:$0xff]  ;;  %vm101_vm0 = vcmask 261120   ;;  %s417_s2 = smov 112  }
  0x17   :  { %117 = vmatpush.msra.mxu0 %v99_v0  ;;  %v97_v2 = vld [vmem:[#allocation7 + $0x8] sm:$0xff]  ;;  %v96_v3 = vld [vmem:[#allocation7] sm:$0xff]  ;;  %v93_v4 = vld [vmem:[#allocation2] sm:$0xff]  ;;  %s418_s4 = smov 32   ;;  %vm215_vm6 = vcmask 130048   ;;  %s419_s17 = smov [#allocation11]  }
  0x18   :  { %v95_v5 = vld [vmem:[#allocation8] sm:$0xf]  ;;  %v164_v8 = vld [vmem:[#allocation10 + $0x10] sm:$0xff]  ;;  %v163_v11 = vld [vmem:[#allocation10 + $0x8] sm:$0xff]  ;;  %s226_s18 = sshll.u32 %s419_s17, 4  ;;  %s228_s21 = sshll.u32 %s478_s5, 4  ;;  %s227_s18 = int_to_ptr.vmem [resolvable:$true] %s226_s18  ;;  %s229_s21 = int_to_ptr.hbm [resolvable:$true] %s228_s21 }
  0x19   :  { %118 = vmatpush.msra.mxu0 %v98_v1  ;;  %v100_v6 = vperm.slane %v95_v5, 0  ;;  %v165_v7 = vld [vmem:[#allocation10 + $0x18] sm:$0xff]  ;;  %v162_v14 = vld [vmem:[#allocation10] sm:$0xff]  ;;  %v145_v38 = vperm.slane %v95_v5, 1  ;;  %v159_v42 = vperm.slane %v95_v5, 2  ;;  %v166_v47 = vperm.slane %v95_v5, 3 }
  0x1a   :  { %182 = vmatpush.msra.mxu1 %v165_v7  ;;  %v94_v63 = vld [vmem:[#allocation5] sm:$0xff]  ;;  %vm218_vm7 = vcmask 392192  }
  0x1b   :  { %119 = vmatpush.msra.mxu0 %v97_v2 }
  0x1c   :  { %183 = vmatpush.msra.mxu1 %v164_v8 }
  0x1d   :  { %120 = vmatpush.msra.mxu0 %v96_v3 }
  0x1e   :  { %240 = vmatmul.msk.f32.vlgmr.msra.gmra.mxu0 %vm101_vm0, %v93_v4  ;;  %184 = vmatpush.msra.mxu1 %v163_v11 }
  0x20   :  { %185 = vmatpush.msra.mxu1 %v162_v14 }
  0x9b   :  { %v122_v9 = vpop.f32.mrf.mxu0 }
  0x9c   :  { %v123_v10 = vadd.f32 %v122_v9, %v100_v6 }
  0x9e   :  { %v125_v12 = vsel %vm101_vm0, %v123_v10, 0.0  ;;  %v133_v13 = vmul.f32 %v123_v10, %v123_v10 }
  0x9f   :  { %v126_v15 = vrot.slane %v125_v12, 4 }
  0xa0   :  { %v134_v16 = vsel %vm101_vm0, %v133_v13, 0.0 }
  0xa1   :  { %v127_v17 = vadd.f32 %v126_v15, %v125_v12  ;;  %v135_v18 = vrot.slane %v134_v16, 4 }
  0xa3   :  { %v128_v19 = vrot.slane %v127_v17, 2  ;;  %v136_v20 = vadd.f32 %v135_v18, %v134_v16 }
  0xa5   :  { %v129_v21 = vadd.f32 %v128_v19, %v127_v17  ;;  %v137_v22 = vrot.slane %v136_v20, 2 }
  0xa7   :  { %v130_v23 = vrot.slane %v129_v21, 1  ;;  %v138_v24 = vadd.f32 %v137_v22, %v136_v20 }
  0xa9   :  { %v131_v25 = vadd.f32 %v130_v23, %v129_v21  ;;  %v139_v26 = vrot.slane %v138_v24, 1 }
  0xab   :  { %v132_v27 = vmul.f32 0.125, %v131_v25  ;;  %v140_v28 = vadd.f32 %v139_v26, %v138_v24 }
  0xad   :  { %v141_v29 = vmul.f32 0.125, %v140_v28  ;;  %v142_v30 = vmul.f32 %v132_v27, %v132_v27  ;;  %v144_v37 = vsub.f32 %v123_v10, %v132_v27 }
  0xaf   :  { %v143_v31 = vsub.f32 %v141_v29, %v142_v30  ;;  %v146_v41 = vmul.f32 %v145_v38, %v144_v37 }
  0xb1   :  { %v147_v32 = vadd.f32 0.001, %v143_v31 }
  0xb3   :  { %252 = vrsqrt.f32 %v147_v32  ;;  %vm154_vm2 = vweird.f32 %v147_v32 }
  0xb9   :  { %v253_v33 = vpop.eup %252 }
  0xba   :  { %v149_v34 = vmul.f32 %v253_v33, %v147_v32  ;;  %vm155_vm1 = vweird.f32 %v253_v33 }
  0xbb   :  { %vm156_vm3 = vmor %vm154_vm2, %vm155_vm1 }
  0xbc   :  { %v150_v35 = vmul.f32 %v253_v33, %v149_v34 }
  0xbe   :  { %v151_v36 = vmul.f32 0.5, %v150_v35 }
  0xc0   :  { %v152_v39 = vsub.f32 1.5, %v151_v36 }
  0xc2   :  { %v153_v40 = vmul.f32 %v253_v33, %v152_v39 }
  0xc4   :  { %v157_v43 = vsel %vm156_vm3, %v253_v33, %v153_v40 }
  0xc5   :  { %v158_v44 = vmul.f32 %v157_v43, %v146_v41 }
  0xc7   :  { %v160_v45 = vadd.f32 %v159_v42, %v158_v44 }
  0xc9   :  { %v161_v46 = vmax.f32 %v160_v45, 0.0 }
  0xcb   :  { %241 = vmatmul.msk.f32.vlgmr.msra.gmra.mxu1 %vm101_vm0, %v161_v46 }
 0x148   :  { %v187_v48 = vpop.f32.mrf.mxu1 }
 0x149   :  { %v188_v49 = vadd.f32 %v187_v48, %v166_v47 }
 0x14b   :  { %v190_v50 = vmul.f32 1.442695, %v188_v49 }
 0x14d   :  { %254 = vpow2.f32 %v190_v50 }
 0x153   :  { %v255_v51 = vpop.eup %254 }
 0x154   :  { %v192_v52 = vadd.f32 1e-16, %v255_v51 }
 0x156   :  { %256 = vrsqrt.f32 %v192_v52  ;;  %vm200_vm4 = vcmp.eq.f32.partialorder %v192_v52, inf  ;;  %v203_v60 = vand.u32 2147483648, %v192_v52  ;;  %vm202_vm5 = vcmp.eq.f32.partialorder %v192_v52, 0.0 }
 0x157   :  { %v216_v3 = vsel %vm215_vm6, %v188_v49, %v192_v52 }
 0x15c   :  { %v257_v53 = vpop.eup %256 }
 0x15d   :  { %v194_v54 = vmul.f32 %v257_v53, %v192_v52 }
 0x15f   :  { %v195_v55 = vmul.f32 %v257_v53, %v194_v54 }
 0x161   :  { %v196_v56 = vmul.f32 0.5, %v195_v55 }
 0x163   :  { %v197_v57 = vsub.f32 1.5, %v196_v56 }
 0x165   :  { %v198_v58 = vmul.f32 %v257_v53, %v197_v57 }
 0x167   :  { %v199_v59 = vmul.f32 %v198_v58, %v192_v52 }
 0x169   :  { %v201_v61 = vsel %vm200_vm4, %v192_v52, %v199_v59 }
 0x16a   :  { %v204_v62 = vsel %vm202_vm5, %v203_v60, %v201_v61 }
 0x16b   :  { %206 = vrot.lane.b32.xlu0 %v204_v62, %s417_s2 }
 0x1dd   :  { %v207_v0 = vpop.permute.xlu0 %206 }
 0x1de   :  { %v209_v1 = vmul.f32 %v207_v0, %v94_v63 }
 0x1e0   :  { %v210_v2 = vadd.f32 %v209_v1, %v188_v49 }
 0x1e2   :  { %212 = vrot.lane.b32.xlu0 %v210_v2, %s418_s4 }
 0x254   :  { %v213_v4 = vpop.permute.xlu0 %212 }
 0x255   :  { %v217_v5 = vsel %vm101_vm0, %v216_v3, %v213_v4 }
 0x256   :  { %v219_v6 = vsel %vm218_vm7, %v217_v5, 0.0 }
 0x257   :  { %220 = vst [vmem:[#allocation11] sm:$0xff] %v219_v6 }
 0x258   :  { %231 = dma.vmem_to_hbm [thread:$0]  %s227_s18, 128, %s229_s21, [#allocation4]  }
 0x259   :  { %408 = dma.done.wait [#allocation4], 128  }
 0x25a   :  { %409 = vsyncadd [#allocation4], 4294967168 }
 0x25b   :  { %236 = vsyncpa [#allocation3], 1 }
 0x25c   :  { %237 = vsyncpa [#allocation6], 1 }
 0x25d   :  { %238 = vsyncpa [#allocation9], 1 }
 0x25e   :  { %239 = vsyncpa [#allocation4], 1 }

</bundles_post_ra>
